<compile_context>
chip_gen: v7x
topology: tpu7x:2x2x1
jax: 0.10.0
libtpu: 0.0.40
codegen_flags: <defaults>
</compile_context>

<pallas_src>
import jax
import jax.numpy as jnp
from jax.experimental import pallas as pl
from jax.experimental.pallas import tpu as pltpu


def _round_up(a, b):
    return (a + b - 1) // b * b


def _round_down(a, b):
    return (a // b) * b


def _confidence_kernel(mean_ref, inv_std_ref, x_ref, o_ref, max_sc):
    # mean_ref / inv_std_ref: (1,) f32 in SMEM.
    # x_ref: (block_rows, block_cols) native dtype in VMEM.
    # o_ref: (block_rows, 1) f32.  max_sc: (block_rows, 1) f32 VMEM scratch.
    k = pl.program_id(1)

    @pl.when(k == 0)
    def _init():
        max_sc[...] = jnp.full_like(max_sc, -jnp.inf)

    x = x_ref[...].astype(jnp.float32)                      # widen after load (cheap, hidden under DMA)
    max_sc[...] = jnp.maximum(max_sc[...], jnp.max(x, axis=-1, keepdims=True))

    @pl.when(k == pl.num_programs(1) - 1)
    def _finalize():
        z = (max_sc[...] - mean_ref[0]) * inv_std_ref[0]    # scalar-hoisted scale
        o_ref[...] = jax.nn.sigmoid(z)


def confidence_measure(x, mean, std, *, target_block_bytes=4 * 1024 * 1024):
    """x: (N, 1, H, W) float; mean/std: (1,) float. Returns (N, 1) float32."""
    N, C, H, W = x.shape
    assert C == 1
    if not jnp.issubdtype(x.dtype, jnp.floating):
        x = x.astype(jnp.float32)
    HW = H * W
    x2 = x.reshape(N, HW)                                   # contiguous reshape, no copy
    itemsize = x2.dtype.itemsize
    # Sublane multiple per dtype: f32 -> 8, bf16/f16 -> 16, 8-bit -> 32.
    row_mult = max(8, 32 // itemsize)

    # --- reduction-axis (columns) tiling -------------------------------------
    if row_mult * HW * itemsize <= target_block_bytes:
        block_cols = HW                                     # full extent: no tiling, no padding needed
        hw_pad = HW
    else:
        block_cols = max(128, _round_down(target_block_bytes // (row_mult * itemsize), 128))
        hw_pad = _round_up(HW, block_cols)
        # pad reduction axis with -inf so the running max is unaffected
        x2 = jnp.pad(x2, ((0, 0), (0, hw_pad - HW)), constant_values=-jnp.inf)

    # --- batch-axis (rows) tiling ---------------------------------------------
    ideal_rows = max(row_mult,
                     _round_down(target_block_bytes // (block_cols * itemsize), row_mult))
    # Either the whole batch in one block (full-extent rule) or a multiple of
    # row_mult; a partial trailing row block is fine (OOB output rows dropped).
    block_rows = N if N <= ideal_rows else ideal_rows
    grid = (pl.cdiv(N, block_rows), hw_pad // block_cols)

    mean_f = mean.reshape(1).astype(jnp.float32)
    inv_std = (1.0 / std.reshape(1)).astype(jnp.float32)    # hoisted out of the kernel

    return pl.pallas_call(
        _confidence_kernel,
        out_shape=jax.ShapeDtypeStruct((N, 1), jnp.float32),
        grid_spec=pltpu.PrefetchScalarGridSpec(
            num_scalar_prefetch=0,
            grid=grid,
            in_specs=[
                pl.BlockSpec(memory_space=pltpu.MemorySpace.SMEM),         # mean
                pl.BlockSpec(memory_space=pltpu.MemorySpace.SMEM),         # 1/std
                pl.BlockSpec((block_rows, block_cols), lambda i, k: (i, k)),
            ],
            out_specs=pl.BlockSpec((block_rows, 1), lambda i, k: (i, 0)),
            scratch_shapes=[pltpu.VMEM((block_rows, 1), jnp.float32)],
        ),
        compiler_params=pltpu.CompilerParams(
            dimension_semantics=("parallel", "arbitrary")),
    )(mean_f, inv_std, x2)


if __name__ == "__main__":
    key = jax.random.PRNGKey(0)
    N, C, H, W = 2, 1, 16, 16
    x = jax.random.normal(key, (N, C, H, W), dtype=jnp.float32)

    # Parameters: shapes (1,) each, as in ConfidenceMeasure.__init__.
    # Default init is mean=-inf, std=1 (output identically 1.0); we use a
    # calibrated state so the kernel math is exercised.
    mean = jnp.array([0.5], dtype=jnp.float32)
    std = jnp.array([2.0], dtype=jnp.float32)

    out = confidence_measure(x, mean, std)
    out = jax.block_until_ready(out)

    # Pure-JAX reference check.
    vmax_ref = jnp.max(x.reshape(N, -1), axis=-1, keepdims=True)
    ref = jax.nn.sigmoid((vmax_ref - mean[0]) / std[0])
    assert out.shape == (N, 1)
    assert jnp.allclose(out, ref, atol=1e-5, rtol=1e-5)

    print("KERNEL_OK")
</pallas_src>

<mosaic_0001>
module attributes {stable_mosaic.version = 11 : i64} {
  func.func @_confidence_kernel(%arg0: i32, %arg1: i32, %arg2: memref<1xf32, #tpu.memory_space<smem>>, %arg3: memref<1xf32, #tpu.memory_space<smem>>, %arg4: memref<2x256xf32, #tpu.memory_space<vmem>>, %arg5: memref<2x1xf32, #tpu.memory_space<vmem>>, %arg6: memref<2x1xf32, #tpu.memory_space<vmem>>) attributes {dimension_semantics = [#tpu.dimension_semantics<parallel>, #tpu.dimension_semantics<arbitrary>], iteration_bounds = array<i64: 1, 1>, scalar_prefetch = 0 : i64, scratch_operands = 1 : i64, tpu.core_type = #tpu.core_type<tc>, window_params = [{transform_indices = @transform_0, window_bounds = array<i64: 1>}, {transform_indices = @transform_1, window_bounds = array<i64: 1>}, {transform_indices = @transform_2, window_bounds = array<i64: 2, 256>}, {transform_indices = @transform_3, window_bounds = array<i64: 2, 1>}]} {
    %c0_i32 = arith.constant 0 : i32
    %0 = arith.cmpi eq, %arg1, %c0_i32 : i32
    %1 = arith.extui %0 : i1 to i32
    %c0_i32_0 = arith.constant 0 : i32
    %2 = arith.cmpi ne, %1, %c0_i32_0 : i32
    scf.if %2 {
      %cst_8 = arith.constant 0xFF800000 : f32
      %12 = vector.broadcast %cst_8 : f32 to vector<2x1xf32>
      %c0_9 = arith.constant 0 : index
      %c0_10 = arith.constant 0 : index
      %13 = vector.load %arg6[%c0_9, %c0_10] : memref<2x1xf32, #tpu.memory_space<vmem>>, vector<2x1xf32>
      tpu.vector_store %arg6[%c0_9, %c0_10], %12 {strides = array<i32>} : memref<2x1xf32, #tpu.memory_space<vmem>>, vector<2x1xf32>,
    } else {
    }
    %c0 = arith.constant 0 : index
    %c0_1 = arith.constant 0 : index
    %3 = vector.load %arg4[%c0, %c0_1] : memref<2x256xf32, #tpu.memory_space<vmem>>, vector<2x256xf32>
    %c0_2 = arith.constant 0 : index
    %c0_3 = arith.constant 0 : index
    %4 = vector.load %arg6[%c0_2, %c0_3] : memref<2x1xf32, #tpu.memory_space<vmem>>, vector<2x1xf32>
    %cst = arith.constant dense<0xFF800000> : vector<2xf32>
    %5 = vector.multi_reduction <maximumf>, %3, %cst [1] : vector<2x256xf32> to vector<2xf32>
    %6 = vector.shape_cast %5 : vector<2xf32> to vector<2x1xf32>
    %7 = arith.maximumf %4, %6 : vector<2x1xf32>
    %c0_4 = arith.constant 0 : index
    %c0_5 = arith.constant 0 : index
    %8 = vector.load %arg6[%c0_4, %c0_5] : memref<2x1xf32, #tpu.memory_space<vmem>>, vector<2x1xf32>
    tpu.vector_store %arg6[%c0_4, %c0_5], %7 {strides = array<i32>} : memref<2x1xf32, #tpu.memory_space<vmem>>, vector<2x1xf32>,
    %c0_i32_6 = arith.constant 0 : i32
    %9 = arith.cmpi eq, %arg1, %c0_i32_6 : i32
    %10 = arith.extui %9 : i1 to i32
    %c0_i32_7 = arith.constant 0 : i32
    %11 = arith.cmpi ne, %10, %c0_i32_7 : i32
    scf.if %11 {
      %c0_8 = arith.constant 0 : index
      %c0_9 = arith.constant 0 : index
      %12 = vector.load %arg6[%c0_8, %c0_9] : memref<2x1xf32, #tpu.memory_space<vmem>>, vector<2x1xf32>
      %c0_10 = arith.constant 0 : index
      %13 = memref.load %arg2[%c0_10] : memref<1xf32, #tpu.memory_space<smem>>
      %14 = vector.broadcast %13 : f32 to vector<2x1xf32>
      %15 = arith.subf %12, %14 : vector<2x1xf32>
      %c0_11 = arith.constant 0 : index
      %16 = memref.load %arg3[%c0_11] : memref<1xf32, #tpu.memory_space<smem>>
      %17 = vector.broadcast %16 : f32 to vector<2x1xf32>
      %18 = arith.mulf %15, %17 : vector<2x1xf32>
      %19 = arith.negf %18 : vector<2x1xf32>
      %20 = math.exp %19 : vector<2x1xf32>
      %cst_12 = arith.constant 1.000000e+00 : f32
      %21 = vector.broadcast %cst_12 : f32 to vector<2x1xf32>
      %22 = arith.addf %21, %20 : vector<2x1xf32>
      %23 = arith.divf %21, %22 : vector<2x1xf32>
      %c0_13 = arith.constant 0 : index
      %c0_14 = arith.constant 0 : index
      %24 = vector.load %arg5[%c0_13, %c0_14] : memref<2x1xf32, #tpu.memory_space<vmem>>, vector<2x1xf32>
      tpu.vector_store %arg5[%c0_13, %c0_14], %23 {strides = array<i32>} : memref<2x1xf32, #tpu.memory_space<vmem>>, vector<2x1xf32>,
    } else {
    }
    return
  }
  func.func @transform_0(%arg0: i32, %arg1: i32) -> i32 {
    %c0_i32 = arith.constant 0 : i32
    %c0_i32_0 = arith.constant 0 : i32
    return %c0_i32 : i32
  }
  func.func @transform_1(%arg0: i32, %arg1: i32) -> i32 {
    %c0_i32 = arith.constant 0 : i32
    %c0_i32_0 = arith.constant 0 : i32
    return %c0_i32 : i32
  }
  func.func @transform_2(%arg0: i32, %arg1: i32) -> (i32, i32) {
    %c0_i32 = arith.constant 0 : i32
    return %arg0, %arg1 : i32, i32
  }
  func.func @transform_3(%arg0: i32, %arg1: i32) -> (i32, i32) {
    %c0_i32 = arith.constant 0 : i32
    %c0_i32_0 = arith.constant 0 : i32
    return %arg0, %c0_i32 : i32, i32
  }
}

</mosaic_0001>

<bundles_post_ra>
// kernel: tpu_custom_call.1
= control target key start
LH: loop header
LB: loop body
LE: loop exit
PB: predicated region body
PF: predicated region fallthrough
CT: control target
= control target key end

     0   :  { %vm35_vm0 = vcmask 1041408   ;;  %vm20_vm1 = vcmask 1024   ;;  %v72_v1 = vmov -inf   ;;  %s108_s2 = inlined_call_operand.vmem [shape: f32[2,256], index: 2, kind: input, shape index: {}]   ;;  %s109_s0 = inlined_call_operand.<no memory space> [shape: f32[1], index: 0, kind: input, shape index: {}]   ;;  %s110_s1 = inlined_call_operand.<no memory space> [shape: f32[1], index: 1, kind: input, shape index: {}]   ;;  %s111_s3 = inlined_call_operand.vmem [shape: f32[2,1], index: 3, kind: output, shape index: {}]  }
   0x1   :  { %v65_v0 = vld.sshfl [vmem:[%s108_s2] sm:$0x33 pattern:$0x76325410]  ;;  %21 = vst.msk [vmem:[#allocation2] sm:$0x3] %vm20_vm1, %v72_v1  ;;  %v49_v9 = vstv %s109_s0  ;;  %v52_v11 = vstv %s110_s1 }
   0x2   :  { %v32_v2 = vcombine.high %v65_v0, %v65_v0  ;;  %v36_v3 = vsel %vm35_vm0, %v65_v0, -inf }
   0x4   :  { %v37_v4 = vsel %vm35_vm0, %v32_v2, -inf }
   0x5   :  { %v38_v5 = vmax.f32 %v36_v3, %v37_v4 }
   0x7   :  { %39 = vmax.xlane.f32.xlu0 %v38_v5 }
   0x8   :  { %v23_v6 = vld [vmem:[#allocation2] sm:$0x3] }
  0x94   :  { %v40_v7 = vpop.xlane.xlu0 %39 }
  0x95   :  { %v41_v8 = vmax.f32 %v23_v6, %v40_v7 }
  0x97   :  { %43 = vst.msk [vmem:[#allocation2] sm:$0x3] %vm20_vm1, %v41_v8 }
  0x9e   :  { %v47_v10 = vld [vmem:[#allocation2] sm:$0x3] }
  0x9f   :  { %v50_v12 = vsub.f32 %v47_v10, %v49_v9 }
  0xa1   :  { %v53_v13 = vmul.f32 %v52_v11, %v50_v12 }
  0xa3   :  { %v66_v14 = vmul.f32 -1.442695, %v53_v13 }
  0xa5   :  { %68 = vpow2.f32 %v66_v14 }
  0xaf   :  { %v69_v15 = vpop.eup %68 }
  0xb0   :  { %v57_v16 = vadd.f32 1.0, %v69_v15 }
  0xb2   :  { %70 = vrcp.f32 %v57_v16 }
  0xbc   :  { %v71_v17 = vpop.eup %70 }
  0xbd   :  { %60 = vst.msk [vmem:[%s111_s3] sm:$0x3] %vm20_vm1, %v71_v17 }

</bundles_post_ra>
